<compile_context>
chip_gen: v7x
topology: tpu7x:2x2x1
jax: 0.10.0
libtpu: 0.0.40
codegen_flags: <defaults>
</compile_context>

<pallas_src>
import functools

import jax
import jax.numpy as jnp
from jax import lax
from jax.experimental import pallas as pl
from jax.experimental.pallas import tpu as pltpu


# Finite "-inf": keeps max()/exp() NaN-free even on fully padded tiles.
_NEG_BIG = -1e30


def _round_up(x, m):
    return (x + m - 1) // m * m


def _next_pow2(n):
    return 1 if n <= 1 else 1 << (n - 1).bit_length()


def _padded_tile_bytes(rows, cols, itemsize):
    # Conservative (8, 128)-padded VMEM footprint of a 2-D buffer.
    return _round_up(max(rows, 1), 8) * _round_up(max(cols, 1), 128) * itemsize


def _attn_cls_kernel(n_ref, x_ref, wvu_ref, bvu_ref, ww_ref, bw_ref, wc_ref,
                     bc_ref, afeat_ref, pred_ref, m_sc, l_sc, acc_sc,
                     *, tile_n, d_pad, k):
    i = pl.program_id(0)
    n_steps = pl.num_programs(0)
    n_valid = n_ref[0]

    @pl.when(i == 0)
    def _():
        m_sc[...] = jnp.full_like(m_sc, _NEG_BIG)
        l_sc[...] = jnp.zeros_like(l_sc)
        acc_sc[...] = jnp.zeros_like(acc_sc)

    # Skip tiles that contain only bucket padding (can only be trailing tiles).
    @pl.when(i * tile_n < n_valid)
    def _():
        x = x_ref[...]                                                # (TN, L)

        # Fused gating projection: one lane-dense matmul covers both V and U.
        g = jnp.dot(x, wvu_ref[...],
                    preferred_element_type=jnp.float32) + bvu_ref[...]  # (TN, 2Dp)
        gate = jnp.tanh(g[:, :d_pad]) * jax.nn.sigmoid(g[:, d_pad:])    # (TN, Dp)

        # Attention logits; mask rows beyond the true bag size with a large
        # finite negative so padded rows contribute exactly 0 after exp().
        a = jnp.dot(gate.astype(ww_ref.dtype), ww_ref[...],
                    preferred_element_type=jnp.float32) + bw_ref[...]   # (TN, K)
        row = i * tile_n + lax.broadcasted_iota(jnp.int32, a.shape, 0)
        a = jnp.where(row < n_valid, a, _NEG_BIG)

        # Online softmax over the instance axis (axis 0 across grid steps).
        m_prev = m_sc[...]                                            # (1, K)
        m_new = jnp.maximum(m_prev, jnp.max(a, axis=0, keepdims=True))
        alpha = jnp.exp(m_prev - m_new)                               # (1, K)
        p = jnp.exp(a - m_new)                                        # (TN, K) f32
        l_sc[...] = alpha * l_sc[...] + jnp.sum(p, axis=0, keepdims=True)

        if k == 1:
            # DTFD default K=1: p^T @ x as a VPU broadcast-multiply +
            # sublane reduce — keeps the MXU free for the gating matmul.
            pax = jnp.sum(p * x.astype(jnp.float32), axis=0, keepdims=True)
        else:
            # Contract over TN (no explicit materialized transpose of p).
            pax = lax.dot_general(p.astype(x.dtype), x,
                                  dimension_numbers=(((0,), (0,)), ((), ())),
                                  preferred_element_type=jnp.float32)   # (K, L)
        acc_sc[...] = jnp.transpose(alpha) * acc_sc[...] + pax
        m_sc[...] = m_new

    @pl.when(i == n_steps - 1)
    def _():
        inv_l = pl.reciprocal(l_sc[...], approx=True)                 # (1, K)
        afeat = acc_sc[...] * jnp.transpose(inv_l)                    # (K, L) f32
        afeat_ref[...] = afeat.astype(afeat_ref.dtype)
        # Classifier (droprate=0 in the reference config -> dropout is a no-op).
        pred = jnp.dot(afeat, wc_ref[...],
                       preferred_element_type=jnp.float32) + bc_ref[...]
        pred_ref[...] = pred.astype(pred_ref.dtype)


def attention_with_classifier(x, params, *, tile_n=2048,
                              compute_dtype=jnp.bfloat16):
    """Returns (afeat, pred); the PyTorch module's forward returns afeat."""
    N, L = x.shape
    D = params["wv"].shape[1]
    K = params["ww"].shape[1]
    C = params["wc"].shape[1]

    # Pad each gating half to a 128-lane multiple so the tanh/sigmoid split
    # inside the kernel is lane-aligned (no relayout copy per step).
    d_pad = _round_up(D, 128)
    wv, wu, bv, bu, ww = (params["wv"], params["wu"], params["bv"],
                          params["bu"], params["ww"])
    if d_pad != D:
        wv = jnp.pad(wv, ((0, 0), (0, d_pad - D)))
        wu = jnp.pad(wu, ((0, 0), (0, d_pad - D)))
        bv = jnp.pad(bv, ((0, 0), (0, d_pad - D)))
        bu = jnp.pad(bu, ((0, 0), (0, d_pad - D)))
        ww = jnp.pad(ww, ((0, d_pad - D), (0, 0)))

    # x and the big matmul weights go in the compute dtype (bf16 by default);
    # biases, classifier weights and all softmax statistics stay f32.
    wvu = jnp.concatenate([wv, wu], axis=1).astype(compute_dtype)     # (L, 2Dp)
    bvu = jnp.concatenate([bv, bu], axis=1).astype(jnp.float32)       # (1, 2Dp)
    ww = ww.astype(compute_dtype)                                     # (Dp, K)
    bw = params["bw"].astype(jnp.float32)
    wc = params["wc"].astype(jnp.float32)
    bc = params["bc"].astype(jnp.float32)
    x_c = x.astype(compute_dtype)

    # Sublane-aligned tile; number of tiles bucketed to a power of two so one
    # compiled kernel serves varying bag sizes (n_valid is a runtime scalar).
    tn = _round_up(min(tile_n, N), 8)
    n_steps = _next_pow2(-(-N // tn))
    n_pad = n_steps * tn
    if n_pad != N:
        x_c = jnp.pad(x_c, ((0, n_pad - N), (0, 0)))

    n_valid = jnp.array([N], jnp.int32)

    kernel = functools.partial(_attn_cls_kernel, tile_n=tn, d_pad=d_pad, k=K)

    grid_spec = pltpu.PrefetchScalarGridSpec(
        num_scalar_prefetch=1,
        grid=(n_steps,),
        in_specs=[
            pl.BlockSpec((tn, L), lambda i, n: (i, 0)),        # x streams over N
            pl.BlockSpec((L, 2 * d_pad), lambda i, n: (0, 0)),  # resident weights
            pl.BlockSpec((1, 2 * d_pad), lambda i, n: (0, 0)),
            pl.BlockSpec((d_pad, K), lambda i, n: (0, 0)),
            pl.BlockSpec((1, K), lambda i, n: (0, 0)),
            pl.BlockSpec((L, C), lambda i, n: (0, 0)),
            pl.BlockSpec((1, C), lambda i, n: (0, 0)),
        ],
        out_specs=[
            pl.BlockSpec((K, L), lambda i, n: (0, 0)),
            pl.BlockSpec((K, C), lambda i, n: (0, 0)),
        ],
        scratch_shapes=[
            pltpu.VMEM((1, K), jnp.float32),   # running max
            pltpu.VMEM((1, K), jnp.float32),   # running denominator
            pltpu.VMEM((K, L), jnp.float32),   # afeat accumulator
        ],
    )

    # Rough double-buffered VMEM footprint; only raise the scoped limit if the
    # default (16 MiB v5e / 32 MiB v6e+) could be exceeded. Cap at 64 MiB
    # (v7x physical VMEM per TensorCore).
    xi = jnp.dtype(compute_dtype).itemsize
    est = (2 * _padded_tile_bytes(tn, L, xi)
           + 2 * _padded_tile_bytes(L, 2 * d_pad, xi)
           + 2 * _padded_tile_bytes(1, 2 * d_pad, 4)
           + 2 * _padded_tile_bytes(d_pad, K, xi)
           + 2 * _padded_tile_bytes(1, K, 4)
           + 2 * _padded_tile_bytes(L, C, 4)
           + 2 * _padded_tile_bytes(1, C, 4)
           + 2 * _padded_tile_bytes(K, L, 4)
           + 2 * _padded_tile_bytes(K, C, 4)
           + 4 * _padded_tile_bytes(1, K, 4)
           + _padded_tile_bytes(K, L, 4))
    vmem_limit = None
    if est > 12 * 1024 * 1024:
        vmem_limit = int(min(64 * 1024 * 1024,
                             max(32 * 1024 * 1024, est + est // 2)))

    cost = pl.CostEstimate(
        flops=int(2 * N * L * 2 * d_pad + 2 * N * d_pad * K
                  + 2 * K * N * L + 2 * K * L * C),
        transcendentals=int(2 * N * d_pad + N * K),
        bytes_accessed=int(n_pad * L * xi + xi * (wvu.size + ww.size)
                           + 4 * (bvu.size + bw.size + wc.size + bc.size)
                           + 4 * (K * L + K * C)),
    )

    afeat, pred = pl.pallas_call(
        kernel,
        out_shape=(jax.ShapeDtypeStruct((K, L), jnp.float32),
                   jax.ShapeDtypeStruct((K, C), jnp.float32)),
        grid_spec=grid_spec,
        compiler_params=pltpu.CompilerParams(
            dimension_semantics=("arbitrary",),
            vmem_limit_bytes=vmem_limit),
        cost_estimate=cost,
    )(n_valid, x_c, wvu, bvu, ww, bw, wc, bc)
    return afeat, pred


def init_params(key, L, D, K, num_cls):
    ks = jax.random.split(key, 8)
    scale = 0.05
    return {
        # attention_V: Linear(L, D), stored pre-transposed (L, D)
        "wv": scale * jax.random.normal(ks[0], (L, D), jnp.float32),
        "bv": scale * jax.random.normal(ks[1], (1, D), jnp.float32),
        # attention_U: Linear(L, D)
        "wu": scale * jax.random.normal(ks[2], (L, D), jnp.float32),
        "bu": scale * jax.random.normal(ks[3], (1, D), jnp.float32),
        # attention_weights: Linear(D, K)
        "ww": scale * jax.random.normal(ks[4], (D, K), jnp.float32),
        "bw": scale * jax.random.normal(ks[5], (1, K), jnp.float32),
        # classifier fc: Linear(L, num_cls)
        "wc": scale * jax.random.normal(ks[6], (L, num_cls), jnp.float32),
        "bc": scale * jax.random.normal(ks[7], (1, num_cls), jnp.float32),
    }


def _reference(x, p):
    av = jnp.tanh(x @ p["wv"] + p["bv"])
    au = jax.nn.sigmoid(x @ p["wu"] + p["bu"])
    a = (av * au) @ p["ww"] + p["bw"]          # (N, K)
    aa = jax.nn.softmax(a.T, axis=1)           # (K, N)
    afeat = aa @ x                             # (K, L)
    pred = afeat @ p["wc"] + p["bc"]
    return afeat, pred


if __name__ == "__main__":
    key = jax.random.PRNGKey(0)
    kx1, kp1, kx2, kx3 = jax.random.split(key, 4)

    # Test 1: small single-tile bag, full f32 compute path (tight check).
    N, L, D, K, C = 8, 32, 16, 1, 2
    x1 = jax.random.normal(kx1, (N, L), jnp.float32)
    p1 = init_params(kp1, L, D, K, C)
    afeat1, pred1 = attention_with_classifier(x1, p1, compute_dtype=jnp.float32)
    afeat1 = jax.block_until_ready(afeat1)
    pred1 = jax.block_until_ready(pred1)
    ra1, rp1 = _reference(x1, p1)
    assert jnp.allclose(afeat1, ra1, atol=1e-3, rtol=1e-3), "afeat1 mismatch"
    assert jnp.allclose(pred1, rp1, atol=1e-3, rtol=1e-3), "pred1 mismatch"

    # Test 2: bf16 compute, D=128 (no gating pad), multiple grid steps plus a
    # fully padded bucket tile (N=300, tile 128 -> 4 bucketed tiles).
    N2, L2, D2 = 300, 128, 128
    x2 = jax.random.normal(kx2, (N2, L2), jnp.float32)
    p2 = init_params(jax.random.PRNGKey(7), L2, D2, K, C)
    afeat2, pred2 = attention_with_classifier(x2, p2, tile_n=128,
                                              compute_dtype=jnp.bfloat16)
    afeat2 = jax.block_until_ready(afeat2)
    pred2 = jax.block_until_ready(pred2)
    ra2, rp2 = _reference(x2, p2)
    assert jnp.allclose(afeat2, ra2, atol=2e-2, rtol=2e-2), "afeat2 mismatch"
    assert jnp.allclose(pred2, rp2, atol=2e-2, rtol=2e-2), "pred2 mismatch"

    # Test 3: K>1 exercises the dot_general pax branch, f32, multi-tile with
    # partial + fully padded tiles.
    N3, L3, D3, K3, C3 = 20, 32, 16, 3, 4
    x3 = jax.random.normal(kx3, (N3, L3), jnp.float32)
    p3 = init_params(jax.random.PRNGKey(11), L3, D3, K3, C3)
    afeat3, pred3 = attention_with_classifier(x3, p3, tile_n=8,
                                              compute_dtype=jnp.float32)
    afeat3 = jax.block_until_ready(afeat3)
    pred3 = jax.block_until_ready(pred3)
    ra3, rp3 = _reference(x3, p3)
    assert jnp.allclose(afeat3, ra3, atol=1e-3, rtol=1e-3), "afeat3 mismatch"
    assert jnp.allclose(pred3, rp3, atol=1e-3, rtol=1e-3), "pred3 mismatch"

    print("KERNEL_OK")
</pallas_src>

<mosaic_0001>
module attributes {stable_mosaic.version = 11 : i64} {
  func.func @_attn_cls_kernel(%arg0: i32, %arg1: memref<1xi32, #tpu.memory_space<smem>>, %arg2: memref<8x32xf32, #tpu.memory_space<vmem>>, %arg3: memref<32x256xf32, #tpu.memory_space<vmem>>, %arg4: memref<1x256xf32, #tpu.memory_space<vmem>>, %arg5: memref<128x1xf32, #tpu.memory_space<vmem>>, %arg6: memref<1x1xf32, #tpu.memory_space<vmem>>, %arg7: memref<32x2xf32, #tpu.memory_space<vmem>>, %arg8: memref<1x2xf32, #tpu.memory_space<vmem>>, %arg9: memref<1x32xf32, #tpu.memory_space<vmem>>, %arg10: memref<1x2xf32, #tpu.memory_space<vmem>>, %arg11: memref<1x1xf32, #tpu.memory_space<vmem>>, %arg12: memref<1x1xf32, #tpu.memory_space<vmem>>, %arg13: memref<1x32xf32, #tpu.memory_space<vmem>>) attributes {dimension_semantics = [#tpu.dimension_semantics<arbitrary>], iteration_bounds = array<i64: 1>, scalar_prefetch = 1 : i64, scratch_operands = 3 : i64, tpu.core_type = #tpu.core_type<tc>, window_params = [{transform_indices = @transform_0, window_bounds = array<i64: 8, 32>}, {pipeline_mode = #tpu.pipeline_mode<synchronous>, transform_indices = @transform_1, window_bounds = array<i64: 32, 256>}, {pipeline_mode = #tpu.pipeline_mode<synchronous>, transform_indices = @transform_2, window_bounds = array<i64: 1, 256>}, {pipeline_mode = #tpu.pipeline_mode<synchronous>, transform_indices = @transform_3, window_bounds = array<i64: 128, 1>}, {pipeline_mode = #tpu.pipeline_mode<synchronous>, transform_indices = @transform_4, window_bounds = array<i64: 1, 1>}, {pipeline_mode = #tpu.pipeline_mode<synchronous>, transform_indices = @transform_5, window_bounds = array<i64: 32, 2>}, {pipeline_mode = #tpu.pipeline_mode<synchronous>, transform_indices = @transform_6, window_bounds = array<i64: 1, 2>}, {pipeline_mode = #tpu.pipeline_mode<synchronous>, transform_indices = @transform_7, window_bounds = array<i64: 1, 32>}, {pipeline_mode = #tpu.pipeline_mode<synchronous>, transform_indices = @transform_8, window_bounds = array<i64: 1, 2>}]} {
    %c0 = arith.constant 0 : index
    %0 = memref.load %arg1[%c0] : memref<1xi32, #tpu.memory_space<smem>>
    %c0_i32 = arith.constant 0 : i32
    %1 = arith.cmpi eq, %arg0, %c0_i32 : i32
    %2 = arith.extui %1 : i1 to i32
    %c0_i32_0 = arith.constant 0 : i32
    %3 = arith.cmpi ne, %2, %c0_i32_0 : i32
    scf.if %3 {
      %cst = arith.constant -1.000000e+30 : f32
      %11 = vector.broadcast %cst : f32 to vector<1x1xf32>
      %c0_4 = arith.constant 0 : index
      %c0_5 = arith.constant 0 : index
      %12 = vector.load %arg11[%c0_4, %c0_5] : memref<1x1xf32, #tpu.memory_space<vmem>>, vector<1x1xf32>
      tpu.vector_store %arg11[%c0_4, %c0_5], %11 {strides = array<i32>} : memref<1x1xf32, #tpu.memory_space<vmem>>, vector<1x1xf32>,
      %cst_6 = arith.constant 0.000000e+00 : f32
      %13 = vector.broadcast %cst_6 : f32 to vector<1x1xf32>
      %c0_7 = arith.constant 0 : index
      %c0_8 = arith.constant 0 : index
      %14 = vector.load %arg12[%c0_7, %c0_8] : memref<1x1xf32, #tpu.memory_space<vmem>>, vector<1x1xf32>
      tpu.vector_store %arg12[%c0_7, %c0_8], %13 {strides = array<i32>} : memref<1x1xf32, #tpu.memory_space<vmem>>, vector<1x1xf32>,
      %cst_9 = arith.constant 0.000000e+00 : f32
      %15 = vector.broadcast %cst_9 : f32 to vector<1x32xf32>
      %c0_10 = arith.constant 0 : index
      %c0_11 = arith.constant 0 : index
      %16 = vector.load %arg13[%c0_10, %c0_11] : memref<1x32xf32, #tpu.memory_space<vmem>>, vector<1x32xf32>
      tpu.vector_store %arg13[%c0_10, %c0_11], %15 {strides = array<i32>} : memref<1x32xf32, #tpu.memory_space<vmem>>, vector<1x32xf32>,
    } else {
    }
    %c8_i32 = arith.constant 8 : i32
    %4 = arith.muli %arg0, %c8_i32 : i32
    %5 = arith.cmpi slt, %4, %0 : i32
    %6 = arith.extui %5 : i1 to i32
    %c0_i32_1 = arith.constant 0 : i32
    %7 = arith.cmpi ne, %6, %c0_i32_1 : i32
    scf.if %7 {
      %c0_4 = arith.constant 0 : index
      %c0_5 = arith.constant 0 : index
      %11 = vector.load %arg2[%c0_4, %c0_5] : memref<8x32xf32, #tpu.memory_space<vmem>>, vector<8x32xf32>
      %c0_6 = arith.constant 0 : index
      %c0_7 = arith.constant 0 : index
      %12 = vector.load %arg3[%c0_6, %c0_7] : memref<32x256xf32, #tpu.memory_space<vmem>>, vector<32x256xf32>
      %cst = arith.constant dense<0.000000e+00> : vector<8x256xf32>
      %13 = tpu.matmul %11, %12, %cst {dimension_numbers = #tpu.dot_dimension_numbers<[1], [0], [0], [1], [0, 0, 1, 1], [], []>} : vector<8x32xf32>, vector<32x256xf32>, vector<8x256xf32> -> vector<8x256xf32>
      %c0_8 = arith.constant 0 : index
      %c0_9 = arith.constant 0 : index
      %14 = vector.load %arg4[%c0_8, %c0_9] : memref<1x256xf32, #tpu.memory_space<vmem>>, vector<1x256xf32>
      %15 = vector.broadcast %14 : vector<1x256xf32> to vector<8x256xf32>
      %16 = arith.addf %13, %15 : vector<8x256xf32>
      %17 = vector.extract_strided_slice %16 {offsets = [0, 0], sizes = [8, 128], strides = [1, 1]} : vector<8x256xf32> to vector<8x128xf32>
      %18 = math.tanh %17 : vector<8x128xf32>
      %19 = vector.extract_strided_slice %16 {offsets = [0, 128], sizes = [8, 128], strides = [1, 1]} : vector<8x256xf32> to vector<8x128xf32>
      %20 = arith.negf %19 : vector<8x128xf32>
      %21 = math.exp %20 : vector<8x128xf32>
      %cst_10 = arith.constant 1.000000e+00 : f32
      %22 = vector.broadcast %cst_10 : f32 to vector<8x128xf32>
      %23 = arith.addf %22, %21 : vector<8x128xf32>
      %24 = arith.divf %22, %23 : vector<8x128xf32>
      %25 = arith.mulf %18, %24 : vector<8x128xf32>
      %c0_11 = arith.constant 0 : index
      %c0_12 = arith.constant 0 : index
      %26 = vector.load %arg5[%c0_11, %c0_12] : memref<128x1xf32, #tpu.memory_space<vmem>>, vector<128x1xf32>
      %cst_13 = arith.constant dense<0.000000e+00> : vector<8x1xf32>
      %27 = tpu.matmul %25, %26, %cst_13 {dimension_numbers = #tpu.dot_dimension_numbers<[1], [0], [0], [1], [0, 0, 1, 1], [], []>} : vector<8x128xf32>, vector<128x1xf32>, vector<8x1xf32> -> vector<8x1xf32>
      %c0_14 = arith.constant 0 : index
      %c0_15 = arith.constant 0 : index
      %28 = vector.load %arg6[%c0_14, %c0_15] : memref<1x1xf32, #tpu.memory_space<vmem>>, vector<1x1xf32>
      %29 = vector.broadcast %28 : vector<1x1xf32> to vector<8x1xf32>
      %30 = arith.addf %27, %29 : vector<8x1xf32>
      %c8_i32_16 = arith.constant 8 : i32
      %31 = arith.muli %arg0, %c8_i32_16 : i32
      %32 = tpu.iota {dimensions = array<i32: 0>} : vector<8x1xi32>
      %33 = vector.broadcast %31 : i32 to vector<8x1xi32>
      %34 = arith.addi %33, %32 : vector<8x1xi32>
      %35 = vector.broadcast %0 : i32 to vector<8x1xi32>
      %36 = arith.cmpi slt, %34, %35 : vector<8x1xi32>
      %cst_17 = arith.constant -1.000000e+30 : f32
      %37 = vector.broadcast %cst_17 : f32 to vector<8x1xf32>
      %38 = arith.select %36, %30, %37 : vector<8x1xi1>, vector<8x1xf32>
      %c0_18 = arith.constant 0 : index
      %c0_19 = arith.constant 0 : index
      %39 = vector.load %arg11[%c0_18, %c0_19] : memref<1x1xf32, #tpu.memory_space<vmem>>, vector<1x1xf32>
      %cst_20 = arith.constant dense<0xFF800000> : vector<1xf32>
      %40 = vector.multi_reduction <maximumf>, %38, %cst_20 [0] : vector<8x1xf32> to vector<1xf32>
      %41 = vector.shape_cast %40 : vector<1xf32> to vector<1x1xf32>
      %42 = arith.maximumf %39, %41 : vector<1x1xf32>
      %43 = arith.subf %39, %42 : vector<1x1xf32>
      %44 = math.exp %43 : vector<1x1xf32>
      %45 = vector.broadcast %42 : vector<1x1xf32> to vector<8x1xf32>
      %46 = arith.subf %38, %45 : vector<8x1xf32>
      %47 = math.exp %46 : vector<8x1xf32>
      %c0_21 = arith.constant 0 : index
      %c0_22 = arith.constant 0 : index
      %48 = vector.load %arg12[%c0_21, %c0_22] : memref<1x1xf32, #tpu.memory_space<vmem>>, vector<1x1xf32>
      %49 = arith.mulf %44, %48 : vector<1x1xf32>
      %cst_23 = arith.constant dense<0.000000e+00> : vector<1xf32>
      %50 = vector.multi_reduction <add>, %47, %cst_23 [0] : vector<8x1xf32> to vector<1xf32>
      %51 = vector.shape_cast %50 : vector<1xf32> to vector<1x1xf32>
      %52 = arith.addf %49, %51 : vector<1x1xf32>
      %c0_24 = arith.constant 0 : index
      %c0_25 = arith.constant 0 : index
      %53 = vector.load %arg12[%c0_24, %c0_25] : memref<1x1xf32, #tpu.memory_space<vmem>>, vector<1x1xf32>
      tpu.vector_store %arg12[%c0_24, %c0_25], %52 {strides = array<i32>} : memref<1x1xf32, #tpu.memory_space<vmem>>, vector<1x1xf32>,
      %54 = vector.broadcast %47 : vector<8x1xf32> to vector<8x32xf32>
      %55 = arith.mulf %54, %11 : vector<8x32xf32>
      %cst_26 = arith.constant dense<0.000000e+00> : vector<32xf32>
      %56 = vector.multi_reduction <add>, %55, %cst_26 [0] : vector<8x32xf32> to vector<32xf32>
      %57 = vector.shape_cast %56 : vector<32xf32> to vector<1x32xf32>
      %58 = tpu.transpose %44, [1, 0] : vector<1x1xf32> -> vector<1x1xf32>
      %c0_27 = arith.constant 0 : index
      %c0_28 = arith.constant 0 : index
      %59 = vector.load %arg13[%c0_27, %c0_28] : memref<1x32xf32, #tpu.memory_space<vmem>>, vector<1x32xf32>
      %60 = vector.broadcast %58 : vector<1x1xf32> to vector<1x32xf32>
      %61 = arith.mulf %60, %59 : vector<1x32xf32>
      %62 = arith.addf %61, %57 : vector<1x32xf32>
      %c0_29 = arith.constant 0 : index
      %c0_30 = arith.constant 0 : index
      %63 = vector.load %arg13[%c0_29, %c0_30] : memref<1x32xf32, #tpu.memory_space<vmem>>, vector<1x32xf32>
      tpu.vector_store %arg13[%c0_29, %c0_30], %62 {strides = array<i32>} : memref<1x32xf32, #tpu.memory_space<vmem>>, vector<1x32xf32>,
      %c0_31 = arith.constant 0 : index
      %c0_32 = arith.constant 0 : index
      %64 = vector.load %arg11[%c0_31, %c0_32] : memref<1x1xf32, #tpu.memory_space<vmem>>, vector<1x1xf32>
      tpu.vector_store %arg11[%c0_31, %c0_32], %42 {strides = array<i32>} : memref<1x1xf32, #tpu.memory_space<vmem>>, vector<1x1xf32>,
    } else {
    }
    %c0_i32_2 = arith.constant 0 : i32
    %8 = arith.cmpi eq, %arg0, %c0_i32_2 : i32
    %9 = arith.extui %8 : i1 to i32
    %c0_i32_3 = arith.constant 0 : i32
    %10 = arith.cmpi ne, %9, %c0_i32_3 : i32
    scf.if %10 {
      %c0_4 = arith.constant 0 : index
      %c0_5 = arith.constant 0 : index
      %11 = vector.load %arg12[%c0_4, %c0_5] : memref<1x1xf32, #tpu.memory_space<vmem>>, vector<1x1xf32>
      %12 = tpu.reciprocal %11 {approx = true} : vector<1x1xf32> -> vector<1x1xf32>
      %c0_6 = arith.constant 0 : index
      %c0_7 = arith.constant 0 : index
      %13 = vector.load %arg13[%c0_6, %c0_7] : memref<1x32xf32, #tpu.memory_space<vmem>>, vector<1x32xf32>
      %14 = tpu.transpose %12, [1, 0] : vector<1x1xf32> -> vector<1x1xf32>
      %15 = vector.broadcast %14 : vector<1x1xf32> to vector<1x32xf32>
      %16 = arith.mulf %13, %15 : vector<1x32xf32>
      %c0_8 = arith.constant 0 : index
      %c0_9 = arith.constant 0 : index
      %17 = vector.load %arg9[%c0_8, %c0_9] : memref<1x32xf32, #tpu.memory_space<vmem>>, vector<1x32xf32>
      tpu.vector_store %arg9[%c0_8, %c0_9], %16 {strides = array<i32>} : memref<1x32xf32, #tpu.memory_space<vmem>>, vector<1x32xf32>,
      %c0_10 = arith.constant 0 : index
      %c0_11 = arith.constant 0 : index
      %18 = vector.load %arg7[%c0_10, %c0_11] : memref<32x2xf32, #tpu.memory_space<vmem>>, vector<32x2xf32>
      %cst = arith.constant dense<0.000000e+00> : vector<1x2xf32>
      %19 = tpu.matmul %16, %18, %cst {dimension_numbers = #tpu.dot_dimension_numbers<[1], [0], [0], [1], [0, 0, 1, 1], [], []>} : vector<1x32xf32>, vector<32x2xf32>, vector<1x2xf32> -> vector<1x2xf32>
      %c0_12 = arith.constant 0 : index
      %c0_13 = arith.constant 0 : index
      %20 = vector.load %arg8[%c0_12, %c0_13] : memref<1x2xf32, #tpu.memory_space<vmem>>, vector<1x2xf32>
      %21 = arith.addf %19, %20 : vector<1x2xf32>
      %c0_14 = arith.constant 0 : index
      %c0_15 = arith.constant 0 : index
      %22 = vector.load %arg10[%c0_14, %c0_15] : memref<1x2xf32, #tpu.memory_space<vmem>>, vector<1x2xf32>
      tpu.vector_store %arg10[%c0_14, %c0_15], %21 {strides = array<i32>} : memref<1x2xf32, #tpu.memory_space<vmem>>, vector<1x2xf32>,
    } else {
    }
    return
  }
  func.func @transform_0(%arg0: i32, %arg1: memref<1xi32, #tpu.memory_space<smem>>) -> (i32, i32) {
    %c0_i32 = arith.constant 0 : i32
    %c0_i32_0 = arith.constant 0 : i32
    return %arg0, %c0_i32 : i32, i32
  }
  func.func @transform_1(%arg0: i32, %arg1: memref<1xi32, #tpu.memory_space<smem>>) -> (i32, i32) {
    %c0_i32 = arith.constant 0 : i32
    %c0_i32_0 = arith.constant 0 : i32
    %c0_i32_1 = arith.constant 0 : i32
    return %c0_i32, %c0_i32_0 : i32, i32
  }
  func.func @transform_2(%arg0: i32, %arg1: memref<1xi32, #tpu.memory_space<smem>>) -> (i32, i32) {
    %c0_i32 = arith.constant 0 : i32
    %c0_i32_0 = arith.constant 0 : i32
    %c0_i32_1 = arith.constant 0 : i32
    return %c0_i32, %c0_i32_0 : i32, i32
  }
  func.func @transform_3(%arg0: i32, %arg1: memref<1xi32, #tpu.memory_space<smem>>) -> (i32, i32) {
    %c0_i32 = arith.constant 0 : i32
    %c0_i32_0 = arith.constant 0 : i32
    %c0_i32_1 = arith.constant 0 : i32
    return %c0_i32, %c0_i32_0 : i32, i32
  }
  func.func @transform_4(%arg0: i32, %arg1: memref<1xi32, #tpu.memory_space<smem>>) -> (i32, i32) {
    %c0_i32 = arith.constant 0 : i32
    %c0_i32_0 = arith.constant 0 : i32
    %c0_i32_1 = arith.constant 0 : i32
    return %c0_i32, %c0_i32_0 : i32, i32
  }
  func.func @transform_5(%arg0: i32, %arg1: memref<1xi32, #tpu.memory_space<smem>>) -> (i32, i32) {
    %c0_i32 = arith.constant 0 : i32
    %c0_i32_0 = arith.constant 0 : i32
    %c0_i32_1 = arith.constant 0 : i32
    return %c0_i32, %c0_i32_0 : i32, i32
  }
  func.func @transform_6(%arg0: i32, %arg1: memref<1xi32, #tpu.memory_space<smem>>) -> (i32, i32) {
    %c0_i32 = arith.constant 0 : i32
    %c0_i32_0 = arith.constant 0 : i32
    %c0_i32_1 = arith.constant 0 : i32
    return %c0_i32, %c0_i32_0 : i32, i32
  }
  func.func @transform_7(%arg0: i32, %arg1: memref<1xi32, #tpu.memory_space<smem>>) -> (i32, i32) {
    %c0_i32 = arith.constant 0 : i32
    %c0_i32_0 = arith.constant 0 : i32
    %c0_i32_1 = arith.constant 0 : i32
    return %c0_i32, %c0_i32_0 : i32, i32
  }
  func.func @transform_8(%arg0: i32, %arg1: memref<1xi32, #tpu.memory_space<smem>>) -> (i32, i32) {
    %c0_i32 = arith.constant 0 : i32
    %c0_i32_0 = arith.constant 0 : i32
    %c0_i32_1 = arith.constant 0 : i32
    return %c0_i32, %c0_i32_0 : i32, i32
  }
}

</mosaic_0001>

<bundles_post_ra>
// kernel: tpu_custom_call.1
= control target key start
LH: loop header
LB: loop body
LE: loop exit
PB: predicated region body
PF: predicated region fallthrough
CT: control target
= control target key end

     0   :  { %s889_s0 = inlined_call_operand.<no memory space> [shape: s32[1], index: 0, kind: input, shape index: {}]   ;;  %s890_s1 = inlined_call_operand.vmem [shape: f32[8,32], index: 1, kind: input, shape index: {}]   ;;  %s891_s2 = inlined_call_operand.vmem [shape: f32[32,256], index: 2, kind: input, shape index: {}]   ;;  %s892_s3 = inlined_call_operand.vmem [shape: f32[1,256], index: 3, kind: input, shape index: {}]   ;;  %s893_s4 = inlined_call_operand.vmem [shape: f32[128,1], index: 4, kind: input, shape index: {}]   ;;  %s894_s5 = inlined_call_operand.<no memory space> [shape: f32[1,1], index: 5, kind: input, shape index: {}]   ;;  %s895_s6 = inlined_call_operand.vmem [shape: f32[32,2], index: 6, kind: input, shape index: {}]   ;;  %s896_s7 = inlined_call_operand.vmem [shape: f32[1,2], index: 7, kind: input, shape index: {}]   ;;  %s897_s8 = inlined_call_operand.hbm [shape: f32[1,32], index: 8, kind: output, shape index: {0}]   ;;  %s898_s9 = inlined_call_operand.hbm [shape: f32[1,2], index: 9, kind: output, shape index: {1}]  }
   0x1   :  { %v16_v0 = vstv %s894_s5 }
   0x2   :  { %17 = vst [vmem:[#allocation7] sm:$0x1] %v16_v0 }
   0x3   :  { %18 = vsyncpa [#allocation9], 0 }
   0x4   :  { %19 = vsyncpa [#allocation11], 0  ;;  %vm39_vm0 = vcmask 0   ;;  %v684_v1 = vmov -1e+30   ;;  %v685_v2 = vmov 0.0  }
   0x5   :  { %40 = vst.msk [vmem:[#allocation2] sm:$0x1] %vm39_vm0, %v684_v1  ;;  %41 = vst.msk [vmem:[#allocation3] sm:$0x1] %vm39_vm0, %v685_v2  ;;  %vm42_vm1 = vcmask 253952   ;;  %p499_p0 = scmp.le.s32.totalorder %s889_s0, 0 }
   0x6   :  { %43 = vst.msk [vmem:[#allocation4] sm:$0x1] %vm42_vm1, %v685_v2  ;;  %v51_v3 = vld [vmem:[%s891_s2 + $0x8] sm:$0xff] (!%p499_p0)  ;;  %v53_v4 = vld [vmem:[%s891_s2 + $0x18] sm:$0xff] (!%p499_p0)  ;;  %v50_v5 = vld [vmem:[%s891_s2] sm:$0xff] (!%p499_p0)  ;;  %v686_v10 = vmov (!%p499_p0), 0.0   ;;  %v60_v42 = vlaneseq (!%p499_p0)  ;;  %v250_v60 = vstv (!%p499_p0), %s889_s0 }
   0x7   :  { %48 = sbr.rel (%p499_p0) target bundleno = 767 (0x2ff), region = 37  ;;  %v572_v6 = vpack.c.bf16 (!%p499_p0), %v53_v4, %v51_v3  ;;  %v52_v7 = vld [vmem:[%s891_s2 + $0x10] sm:$0xff] (!%p499_p0)  ;;  %v55_v8 = vld [vmem:[%s891_s2 + $0x28] sm:$0xff] (!%p499_p0)  ;;  %v57_v9 = vld [vmem:[%s891_s2 + $0x38] sm:$0xff] (!%p499_p0)  ;;  %138 = vmatprep.mubr.f32.mxu0 (!%p499_p0), %v686_v10  ;;  %vm70_vm2 = vcmask (!%p499_p0), 261120   ;;  %v687_v20 = vmov (!%p499_p0), 0.0|0.0  }
   0x8   :  { %v574_v11 = vpack.c.bf16 (!%p499_p0), %v52_v7, %v50_v5  ;;  %v576_v12 = vpack.c.bf16 (!%p499_p0), %v57_v9, %v55_v8  ;;  %v54_v13 = vld [vmem:[%s891_s2 + $0x20] sm:$0xff] (!%p499_p0)  ;;  %v56_v14 = vld [vmem:[%s891_s2 + $0x30] sm:$0xff] (!%p499_p0)  ;;  %v154_v18 = vld [vmem:[%s893_s4 + $0x8] sm:$0xff] (!%p499_p0)  ;;  %580 = vmatprep.subr.bf16.mxu1 (!%p499_p0), %v687_v20  ;;  %vm688_vm3 = vmmov (!%p499_p0), 0   ;;  %v61_v43 = vshrl.u32 (!%p499_p0), %v60_v42, 7 }
   0x9   :  { %573 = vmatprep.subr.bf16.mxu0 (!%p499_p0), %v572_v6  ;;  %v578_v15 = vpack.c.bf16 (!%p499_p0), %v56_v14, %v54_v13  ;;  %v783_v16 = vld [vmem:[%s890_s1] sm:$0xff] (!%p499_p0)  ;;  %v155_v21 = vld [vmem:[%s893_s4 + $0x10] sm:$0xff] (!%p499_p0)  ;;  %v156_v22 = vld [vmem:[%s893_s4 + $0x18] sm:$0xff] (!%p499_p0)  ;;  %558 = vmatprep.mubr.msk.f32.mxu1 (!%p499_p0), %vm688_vm3, %v686_v10  ;;  %v689_v59 = vmov (!%p499_p0), 0   ;;  %vm254_vm5 = vcmask (!%p499_p0), 7168  }
   0xa   :  { %575 = vmatpush1.bf16.msra.mxu0 (!%p499_p0), %v574_v11  ;;  %v153_v17 = vld [vmem:[%s893_s4] sm:$0xff] (!%p499_p0)  ;;  %v584_v23 = vpack.c.bf16 (!%p499_p0), %v156_v22, %v155_v21  ;;  %v158_v25 = vld [vmem:[%s893_s4 + $0x28] sm:$0xff] (!%p499_p0)  ;;  %v159_v27 = vld [vmem:[%s893_s4 + $0x30] sm:$0xff] (!%p499_p0)  ;;  %v66_v44 = vsub.s32 (!%p499_p0), 1, %v61_v43  ;;  %v62_v51 = vsub.s32 (!%p499_p0), 0, %v61_v43  ;;  %622 = vset.pattern.permute.xlu1 (!%p499_p0), %v689_v59  ;;  %vm251_vm4 = vcmp.lt.s32.totalorder (!%p499_p0), %v61_v43, %v250_v60 }
   0xb   :  { %577 = vmatprep.subr.bf16.mxu0 (!%p499_p0), %v576_v12  ;;  %v581_v19 = vpack.c.bf16 (!%p499_p0), %v154_v18, %v153_v17  ;;  %v157_v24 = vld [vmem:[%s893_s4 + $0x20] sm:$0xff] (!%p499_p0)  ;;  %v160_v28 = vld [vmem:[%s893_s4 + $0x38] sm:$0xff] (!%p499_p0)  ;;  %v162_v31 = vld [vmem:[%s893_s4 + $0x48] sm:$0xff] (!%p499_p0) }
   0xc   :  { %v587_v26 = vpack.c.bf16 (!%p499_p0), %v158_v25, %v157_v24  ;;  %v590_v29 = vpack.c.bf16 (!%p499_p0), %v160_v28, %v159_v27  ;;  %v161_v30 = vld [vmem:[%s893_s4 + $0x40] sm:$0xff] (!%p499_p0)  ;;  %v163_v33 = vld [vmem:[%s893_s4 + $0x50] sm:$0xff] (!%p499_p0)  ;;  %v164_v34 = vld [vmem:[%s893_s4 + $0x58] sm:$0xff] (!%p499_p0) }
   0xd   :  { %582 = vmatpush3.bf16.msra.mxu1 (!%p499_p0), %v581_v19  ;;  %v593_v32 = vpack.c.bf16 (!%p499_p0), %v162_v31, %v161_v30  ;;  %v596_v35 = vpack.c.bf16 (!%p499_p0), %v164_v34, %v163_v33  ;;  %v165_v36 = vld [vmem:[%s893_s4 + $0x60] sm:$0xff] (!%p499_p0)  ;;  %v166_v37 = vld [vmem:[%s893_s4 + $0x68] sm:$0xff] (!%p499_p0)  ;;  %v167_v39 = vld [vmem:[%s893_s4 + $0x70] sm:$0xff] (!%p499_p0) }
   0xe   :  { %579 = vmatpush1.bf16.msra.mxu0 %v578_v15  ;;  %583 = vmatprep.subr.bf16.mxu1 %v687_v20  ;;  %v599_v38 = vpack.c.bf16 %v166_v37, %v165_v36  ;;  %v168_v40 = vld [vmem:[%s893_s4 + $0x78] sm:$0xff]  ;;  %v58_v45 = vld [vmem:[%s892_s3] sm:$0x3]  ;;  %v502_v61 = vld [vmem:[#allocation7] ss:$0 sm:$0xff] }
   0xf   :  { %v602_v41 = vpack.c.bf16 %v168_v40, %v167_v39  ;;  %v67_v46 = vrot.slane %v58_v45, %v66_v44  ;;  %v63_v52 = vrot.slane %v58_v45, %v62_v51  ;;  %v253_v9 = vld [vmem:[#allocation2] sm:$0x1]  ;;  %v275_v25 = vld [vmem:[#allocation3] sm:$0x1]  ;;  %v332_v39 = vld [vmem:[#allocation4] sm:$0x1] }
  0x11   :  { %500 = vmatmul.mubr.msk.f32.vlgmr.msra.gmra.mrb[0].mxu0 %vm70_vm2, %v783_v16  ;;  %585 = vmatpush3.bf16.msra.mxu1 %v584_v23 }
  0x12   :  { %586 = vmatprep.subr.bf16.mxu1 %v687_v20 }
  0x15   :  { %588 = vmatpush3.bf16.msra.mxu1 %v587_v26 }
  0x16   :  { %589 = vmatprep.subr.bf16.mxu1 %v687_v20 }
  0x19   :  { %591 = vmatpush3.bf16.msra.mxu1 %v590_v29 }
  0x1a   :  { %592 = vmatprep.subr.bf16.mxu1 %v687_v20 }
  0x1d   :  { %594 = vmatpush3.bf16.msra.mxu1 %v593_v32 }
  0x1e   :  { %595 = vmatprep.subr.bf16.mxu1 %v687_v20 }
  0x21   :  { %597 = vmatpush3.bf16.msra.mxu1 %v596_v35 }
  0x22   :  { %598 = vmatprep.subr.bf16.mxu1 %v687_v20 }
  0x25   :  { %600 = vmatpush3.bf16.msra.mxu1 %v599_v38 }
  0x26   :  { %601 = vmatprep.subr.bf16.mxu1 %v687_v20 }
  0x29   :  { %603 = vmatpush3.bf16.msra.mxu1 %v602_v41 }
  0xe4   :  { %v140_v47 = vpop.f32.mrb[0].mxu0 }
  0xe5   :  { %v142_v48 = vpop.f32.mrb[1].mxu0  ;;  %v141_v53 = vadd.f32 %v140_v47, %v63_v52 }
  0xe6   :  { %v143_v49 = vadd.f32 %v142_v48, %v67_v46 }
  0xe8   :  { %v501_v50 = vmul.f32 -1.442695, %v143_v49 }
  0xea   :  { %623 = vpow2.f32 %v501_v50 }
  0xeb   :  { %625 = vtanh.f32 %v141_v53 }
  0xf4   :  { %v624_v54 = vpop.eup %623 }
  0xf5   :  { %v149_v55 = vadd.f32 1.0, %v624_v54  ;;  %v626_v56 = vpop.eup %625 }
  0xf7   :  { %627 = vrcp.f32 %v149_v55 }
 0x101   :  { %v628_v57 = vpop.eup %627 }
 0x102   :  { %v152_v58 = vmul.f32 %v628_v57, %v626_v56 }
 0x104   :  { %559 = vmatmul.mubr.f32.vlgmr.msra.gmra.mrb[0].mxu1 %v152_v58 }
 0x1d7   :  { %v242_v62 = vpop.f32.mrb[0].mxu1 }
 0x1d8   :  { %v243_v63 = vadd.f32 %v502_v61, %v242_v62  ;;  %v560_v0 = vpop.f32.mrb[1].mxu1 }
 0x1da   :  { %v252_v1 = vsel %vm251_vm4, %v243_v63, -1e+30 }
 0x1db   :  { %v255_v3 = vsel %vm254_vm5, %v252_v1, -inf }
 0x1dc   :  { %v256_v4 = vrot.slane %v255_v3, 4 }
 0x1de   :  { %v257_v5 = vmax.f32 %v255_v3, %v256_v4 }
 0x1e0   :  { %v258_v6 = vrot.slane %v257_v5, 2 }
 0x1e2   :  { %v259_v7 = vmax.f32 %v257_v5, %v258_v6 }
 0x1e4   :  { %v260_v8 = vrot.slane %v259_v7, 1 }
 0x1e6   :  { %v261_v10 = vmax.f32 %v259_v7, %v260_v8 }
 0x1e8   :  { %v262_v11 = vmax.f32 %v253_v9, %v261_v10 }
 0x1ea   :  { %v270_v12 = vrot.slane %v262_v11, %v62_v51  ;;  %342 = vst.msk [vmem:[#allocation2] sm:$0x1] %vm39_vm0, %v262_v11  ;;  %v263_v13 = vsub.f32 %v253_v9, %v262_v11 }
 0x1ec   :  { %v272_v14 = vsub.f32 %v252_v1, %v270_v12  ;;  %v264_v15 = vmul.f32 1.442695, %v263_v13 }
 0x1ee   :  { %v273_v17 = vmul.f32 1.442695, %v272_v14  ;;  %629 = vpow2.f32 %v264_v15 }
 0x1f0   :  { %631 = vpow2.f32 %v273_v17 }
 0x1f8   :  { %v630_v18 = vpop.eup %629 }
 0x1f9   :  { %300 = vxpose.xlu0.b32.start.end [1/1] (short) (narrow) %v630_v18, 8  ;;  %v276_v28 = vmul.f32 %v630_v18, %v275_v25 }
 0x1fa   :  { %v632_v19 = vpop.eup %631 }
 0x1fb   :  { %v277_v20 = vsel %vm254_vm5, %v632_v19, 0.0 }
 0x1fc   :  { %v278_v21 = vrot.slane %v277_v20, 4 }
 0x1fe   :  { %v279_v22 = vadd.f32 %v278_v21, %v277_v20 }
 0x200   :  { %v280_v23 = vrot.slane %v279_v22, 2 }
 0x202   :  { %v281_v24 = vadd.f32 %v280_v23, %v279_v22 }
 0x204   :  { %v282_v26 = vrot.slane %v281_v24, 1 }
 0x206   :  { %v283_v27 = vadd.f32 %v282_v26, %v281_v24 }
 0x208   :  { %v284_v29 = vadd.f32 %v283_v27, %v276_v28 }
 0x20a   :  { %286 = vst.msk [vmem:[#allocation3] sm:$0x1] %vm39_vm0, %v284_v29 }
 0x222   :  { %621 = vset.pattern.permute.xlu0 %v689_v59 }
 0x223   :  { %289 = vperm.xlu0 %621, %v632_v19  }
 0x279   :  { %v316_v30 = vpop.trf.xlu0 }
 0x27a   :  { %335 = vperm.xlu1 %622, %v316_v30  }
 0x2a2   :  { %v290_v31 = vpop.permute.xlu0 %289 }
 0x2a3   :  { %v292_v32 = vmul.f32 %v290_v31, %v783_v16 }
 0x2a5   :  { %v293_v33 = vsel %vm70_vm2, %v292_v32, 0.0 }
 0x2a6   :  { %v294_v34 = vrot.slane %v293_v33, 4 }
 0x2a8   :  { %v295_v35 = vadd.f32 %v294_v34, %v293_v33 }
 0x2aa   :  { %v296_v36 = vrot.slane %v295_v35, 2 }
 0x2ac   :  { %v297_v37 = vadd.f32 %v296_v36, %v295_v35 }
 0x2ae   :  { %v298_v38 = vrot.slane %v297_v37, 1 }
 0x2b0   :  { %v299_v41 = vadd.f32 %v298_v38, %v297_v37 }
 0x2f9   :  { %v336_v40 = vpop.permute.xlu1 %335 }
 0x2fa   :  { %v338_v42 = vmul.f32 %v336_v40, %v332_v39 }
 0x2fc   :  { %v339_v43 = vadd.f32 %v338_v42, %v299_v41 }
 0x2fe   :  { %341 = vst.msk [vmem:[#allocation4] sm:$0x1] %vm42_vm1, %v339_v43 }
 0x2ff PF:  { %v346_v44 = vld [vmem:[#allocation3] sm:$0x1]  ;;  %v390_v46 = vld [vmem:[%s895_s6 + $0x8] sm:$0xff]  ;;  %v391_v47 = vld [vmem:[%s895_s6 + $0x10] sm:$0xff]  ;;  %v690_v48 = vmov 0.0|0.0   ;;  %v691_v52 = vmov 0  }
 0x300   :  { %634 = vrcp.f32 %v346_v44  ;;  %v389_v16 = vld [vmem:[%s895_s6] sm:$0xff]  ;;  %604 = vmatprep.subr.bf16.mxu0 %v690_v48  ;;  %v392_v50 = vld [vmem:[%s895_s6 + $0x18] sm:$0xff]  ;;  %vm692_vm6 = vmmov 0   ;;  %vm394_vm7 = vcmask 261120   ;;  %s693_s23 = smov [#allocation8]  }
 0x301   :  { %v605_v49 = vpack.c.bf16 %v390_v46, %v389_v16  ;;  %v608_v51 = vpack.c.bf16 %v392_v50, %v391_v47  ;;  %569 = vmatprep.mubr.msk.f32.mxu0 %vm692_vm6, %v685_v2  ;;  %s476_s6 = sshll.u32 %s693_s23, 4  ;;  %s477_s6 = int_to_ptr.vmem [resolvable:$true] %s476_s6 }
 0x302   :  { %s636_s24 = scalar_lea.vmem %s477_s6, 16  ;;  %s640_s25 = scalar_lea.vmem %s477_s6, 32 }
 0x303   :  { %606 = vmatpush3.bf16.msra.mxu0 %v605_v49  ;;  %p637_p1 = scmp.ne.s32.totalorder %s477_s6, %s636_s24  ;;  %p641_p2 = scmp.lt.s32.totalorder %s477_s6, %s477_s6 }
 0x304   :  { %607 = vmatprep.subr.bf16.mxu0 %v690_v48  ;;  %p642_p3 = scmp.lt.s32.totalorder %s640_s25, %s636_s24 }
 0x305   :  { %v348_v54 = vld [vmem:[#allocation4] sm:$0x1] }
 0x306   :  { %p643_p4 = por %p642_p3, %p641_p2 }
 0x307   :  { %609 = vmatpush3.bf16.msra.mxu0 %v608_v51 }
 0x308   :  { %p644_p5 = pnand %p643_p4, %p637_p1 }
 0x30a   :  { %v635_v45 = vpop.eup %634 }
 0x30b   :  { %349 = vxpose.xlu0.b32.start.end [1/1] (short) (narrow) %v635_v45, 8 }
 0x334   :  { %633 = vset.pattern.permute.xlu0 %v691_v52 }
 0x38b   :  { %v365_v53 = vpop.trf.xlu0 }
 0x38c   :  { %383 = vperm.xlu0 %633, %v365_v53  }
 0x40b   :  { %v384_v55 = vpop.permute.xlu0 %383 }
 0x40c   :  { %v386_v56 = vmul.f32 %v384_v55, %v348_v54 }
 0x40e   :  { %388 = vst.msk [vmem:[#allocation8] sm:$0x1] %vm42_vm1, %v386_v56  ;;  %570 = vmatmul.mubr.msk.f32.vlgmr.msra.gmra.mrb[0].mxu0 %vm394_vm7, %v386_v56 }
 0x40f   :  { %647 = shalt.err (!%p644_p5)
}
 0x410   :  { %s648_s28 = scalar_lea.hbm %s897_s8, 16 }
 0x411   :  { %p649_p6 = scmp.ne.s32.totalorder %s897_s8, %s648_s28  ;;  %p652_p7 = scmp.lt.u32.totalorder %s648_s28, %s897_s8 }
 0x413   :  { %p654_p8 = pnand %p652_p7, %p649_p6 }
 0x415   :  { %657 = shalt.err (!%p654_p8)
}
 0x416   :  { %479 = dma.vmem_to_hbm [thread:$0]  %s477_s6, 16, %s897_s8, [#allocation9]   ;;  %v393_v2 = vld [vmem:[%s896_s7] sm:$0x1]  ;;  %vm468_vm8 = vcmask 8192  }
 0x417   :  { %s694_s13 = smov [#allocation10]  }
 0x418   :  { %s486_s14 = sshll.u32 %s694_s13, 4  ;;  %s487_s14 = int_to_ptr.vmem [resolvable:$true] %s486_s14 }
 0x419   :  { %s658_s15 = scalar_lea.vmem %s487_s14, 16  ;;  %s662_s3 = scalar_lea.vmem %s487_s14, 32 }
 0x41a   :  { %p659_p9 = scmp.ne.s32.totalorder %s487_s14, %s658_s15  ;;  %p663_p10 = scmp.lt.s32.totalorder %s487_s14, %s487_s14 }
 0x41b   :  { %p664_p11 = scmp.lt.s32.totalorder %s662_s3, %s658_s15 }
 0x41d   :  { %p665_p12 = por %p664_p11, %p663_p10 }
 0x41f   :  { %p666_p13 = pnand %p665_p12, %p659_p9 }
 0x4e1   :  { %v464_v57 = vpop.f32.mrb[0].mxu0 }
 0x4e2   :  { %v465_v58 = vadd.f32 %v464_v57, %v393_v2  ;;  %v571_v59 = vpop.f32.mrb[1].mxu0 }
 0x4e4   :  { %469 = vst.msk [vmem:[#allocation10] sm:$0x1] %vm468_vm8, %v465_v58 }
 0x4e5   :  { %669 = shalt.err (!%p666_p13)
}
 0x4e6   :  { %s670_s7 = scalar_lea.hbm %s898_s9, 16 }
 0x4e7   :  { %p671_p0 = scmp.ne.s32.totalorder %s898_s9, %s670_s7  ;;  %p674_p1 = scmp.lt.u32.totalorder %s670_s7, %s898_s9 }
 0x4e9   :  { %p676_p2 = pnand %p674_p1, %p671_p0 }
 0x4eb   :  { %679 = shalt.err (!%p676_p2)
}
 0x4ec   :  { %489 = dma.vmem_to_hbm [thread:$0]  %s487_s14, 16, %s898_s9, [#allocation11]  }
 0x4ed   :  { %680 = dma.done.wait [#allocation9], 16  }
 0x4ee   :  { %681 = vsyncadd [#allocation9], 4294967280 }
 0x4ef   :  { %682 = dma.done.wait [#allocation11], 16  }
 0x4f0   :  { %683 = vsyncadd [#allocation11], 4294967280 }
 0x4f1   :  { %496 = vsyncpa [#allocation9], 1 }
 0x4f2   :  { %497 = vsyncpa [#allocation11], 1 }

</bundles_post_ra>
